<compile_context>
chip_gen: v6e
topology: v6e:2x2x1
jax: 0.10.0
libtpu: 0.0.40
codegen_flags: <defaults>
</compile_context>

<pallas_src>
import functools

import jax
import jax.numpy as jnp
from jax.experimental import pallas as pl
from jax.experimental.pallas import tpu as pltpu

_NEG_INF = -1e30  # finite "masked" value: avoids inf arithmetic / NaN edge cases


def _layernorm(x, g, b, eps=1e-5):
    mu = jnp.mean(x, axis=-1, keepdims=True)
    var = jnp.mean((x - mu) ** 2, axis=-1, keepdims=True)
    return (x - mu) * jax.lax.rsqrt(var + eps) * g + b


# --------------------------------------------------------------------------------
# Kernel 1: LN1 + fused QKV projection, emitting head-major bf16 Q/K/V.
# Grid = (batch, token tile). Runs once per token (projection redundancy removed).
# --------------------------------------------------------------------------------
def qkv_proj_kernel(num_heads, head_dim,
                    x_ref, ln1g_ref, ln1b_ref, wq_ref, wk_ref, wv_ref,
                    q_ref, k_ref, v_ref):
    xn = _layernorm(x_ref[0], ln1g_ref[0], ln1b_ref[0]).astype(jnp.bfloat16)

    def project(w_ref, out_ref):
        # one fused (tile, E) @ (E, H*Hd) projection for all heads (full MXU width)
        y = jnp.dot(xn, w_ref[...], preferred_element_type=jnp.float32)
        yb = y.astype(jnp.bfloat16)
        # layout-only head split, once per token (hoisted out of the attention loop).
        # TODO(synk): replace static per-head slice stores with a single lane-aware
        # relayout (pltpu.einshape 't(hd)->htd') once grouping syntax is verified.
        for h in range(num_heads):
            out_ref[0, h] = yb[:, h * head_dim:(h + 1) * head_dim]

    project(wq_ref, q_ref)
    project(wk_ref, k_ref)
    project(wv_ref, v_ref)


# --------------------------------------------------------------------------------
# Kernel 2: flash-attention over head-major Q/K/V + fused epilogue
# (output proj, residual, LN2, MLP, residual).
# Grid = (batch, q-row tile, kv tile); kv (last axis) is the reduction axis.
# --------------------------------------------------------------------------------
def attn_block_kernel(num_heads, head_dim, tq, tk,
                      xq_ref, q_ref, k_ref, v_ref,
                      wo_ref, bo_ref, ln2g_ref, ln2b_ref,
                      w1_ref, b1_ref, w2_ref, b2_ref,
                      o_ref,
                      m_sc, l_sc, acc_sc):
    qi = pl.program_id(1)
    ki = pl.program_id(2)

    # ---- per-(batch, q-tile) init of online-softmax state -------------------------
    @pl.when(ki == 0)
    def _init():
        m_sc[...] = jnp.full(m_sc.shape, _NEG_INF, m_sc.dtype)
        l_sc[...] = jnp.zeros(l_sc.shape, l_sc.dtype)
        acc_sc[...] = jnp.zeros(acc_sc.shape, acc_sc.dtype)

    def attend(apply_mask):
        q = q_ref[0]            # (H, tq, Hd) bf16
        k = k_ref[0]            # (H, tk, Hd) bf16
        v = v_ref[0]            # (H, tk, Hd) bf16
        # all heads in one batched contraction.
        # NOTE: reference does NOT scale by 1/sqrt(head_dim) — reproduced exactly.
        s = jnp.einsum('htd,hsd->hts', q, k,
                       preferred_element_type=jnp.float32)       # (H, tq, tk) f32
        if apply_mask:          # only diagonal-straddling tiles pay for the mask
            row = qi * tq + jax.lax.broadcasted_iota(jnp.int32, (tq, tk), 0)
            col = ki * tk + jax.lax.broadcasted_iota(jnp.int32, (tq, tk), 1)
            s = jnp.where((row >= col)[None, :, :], s, _NEG_INF)

        m_prev = m_sc[...]
        m_new = jnp.maximum(m_prev, jnp.max(s, axis=-1, keepdims=True))
        alpha = jnp.exp(m_prev - m_new)
        p = jnp.exp(s - m_new)                                    # f32 softmax math
        l_sc[...] = alpha * l_sc[...] + jnp.sum(p, axis=-1, keepdims=True)
        acc_sc[...] = alpha * acc_sc[...] + jnp.einsum(
            'hts,hsd->htd', p.astype(jnp.bfloat16), v,
            preferred_element_type=jnp.float32)
        m_sc[...] = m_new

    # diagonal tile: needs causal mask; strictly-below-diagonal: no mask;
    # strictly-above-diagonal: skipped (and its K/V DMA is elided by the clamped
    # index_map in the wrapper).
    @pl.when(ki == qi)
    def _diag():
        attend(True)

    @pl.when(ki < qi)
    def _interior():
        attend(False)

    # ---- finalize: normalize, output proj, residual, LN2, MLP, residual, store ----
    @pl.when(ki == pl.num_programs(2) - 1)
    def _finalize():
        x_q = xq_ref[0]                                           # (tq, E) f32
        inv_l = pl.reciprocal(l_sc[...], approx=True)             # EUP; frees VALU
        att = (acc_sc[...] * inv_l).astype(jnp.bfloat16)          # (H, tq, Hd)
        # batched per-head output projection + head reduction: no concat/transpose
        yh = jnp.einsum('htd,hde->hte', att, wo_ref[...],
                        preferred_element_type=jnp.float32)       # (H, tq, E) f32
        y = jnp.sum(yh, axis=0) + bo_ref[0]
        x1 = x_q + y                                              # residual 1 (f32)

        xn2 = _layernorm(x1, ln2g_ref[0], ln2b_ref[0]).astype(jnp.bfloat16)
        h1 = jnp.dot(xn2, w1_ref[...], preferred_element_type=jnp.float32) + b1_ref[0]
        h1 = jnp.maximum(h1, 0.0).astype(jnp.bfloat16)
        ff = jnp.dot(h1, w2_ref[...], preferred_element_type=jnp.float32) + b2_ref[0]

        o_ref[0] = (x1 + ff).astype(o_ref.dtype)                  # single fused store


# --------------------------------------------------------------------------------
# Wrapper
# --------------------------------------------------------------------------------
def _vmem_budget():
    # ~75% of physical VMEM: ~48 MiB on v7x (64 MiB/TC), ~96 MiB on v6e/v5e (128 MiB).
    try:
        cap = int(pltpu.get_tpu_info().vmem_capacity_bytes)
    except Exception:
        cap = 64 * 1024 * 1024
    return max(32 * 1024 * 1024, min(3 * cap // 4, 100 * 1024 * 1024))


def prepare_params(params, num_heads):
    """One-time (outside the forward) bf16 cast / layout prep of the weights."""
    ln1_g, ln1_b, wq, wk, wv, wo, bo, ln2_g, ln2_b, w1, b1, w2, b2 = params
    E = wq.shape[0]
    head_dim = E // num_heads
    bf = lambda w: w.astype(jnp.bfloat16)
    return dict(
        ln1_g=ln1_g, ln1_b=ln1_b,
        wq=bf(wq), wk=bf(wk), wv=bf(wv),
        wo=bf(wo).reshape(num_heads, head_dim, E),   # head-major for 'htd,hde->hte'
        bo=bo, ln2_g=ln2_g, ln2_b=ln2_b,
        w1=bf(w1), b1=b1, w2=bf(w2), b2=b2,
    )


def block_forward(x, prep, num_heads, row_tile=256):
    B, T, E = x.shape
    assert E % num_heads == 0
    head_dim = E // num_heads
    tile = min(T, row_tile)
    assert T % tile == 0, "ragged T not supported"  # TODO(synk): masked ragged tiles
    tq = tk = tile
    n_t = pl.cdiv(T, tile)
    vmem_limit = _vmem_budget()

    # whole-array VMEM residency for constants: loaded once, not double-buffered.
    const = lambda: pl.BlockSpec(memory_space=pltpu.MemorySpace.VMEM)

    # ---- kernel 1: LN1 + QKV projection (head-major bf16) -------------------------
    qkv_shape = jax.ShapeDtypeStruct((B, num_heads, T, head_dim), jnp.bfloat16)
    hm_spec = lambda: pl.BlockSpec((1, num_heads, tile, head_dim),
                                   lambda b, ti: (b, 0, ti, 0))
    q, k, v = pl.pallas_call(
        functools.partial(qkv_proj_kernel, num_heads, head_dim),
        out_shape=(qkv_shape, qkv_shape, qkv_shape),
        grid=(B, n_t),
        in_specs=[
            pl.BlockSpec((1, tile, E), lambda b, ti: (b, ti, 0)),   # x token tiles
            const(), const(),                                       # ln1 g/b
            const(), const(), const(),                              # wq, wk, wv
        ],
        out_specs=(hm_spec(), hm_spec(), hm_spec()),
        compiler_params=pltpu.CompilerParams(
            dimension_semantics=("parallel", "parallel"),
            vmem_limit_bytes=vmem_limit,
        ),
    )(x, prep['ln1_g'], prep['ln1_b'], prep['wq'], prep['wk'], prep['wv'])

    # ---- kernel 2: flash attention + fused epilogue --------------------------------
    # kv index clamped to causal range: fully-masked (upper-triangle) steps
    # re-reference the previous block -> no wasted DMA.
    kv_spec = lambda: pl.BlockSpec((1, num_heads, tk, head_dim),
                                   lambda b, qi, ki: (b, 0, jnp.minimum(ki, qi), 0))
    out = pl.pallas_call(
        functools.partial(attn_block_kernel, num_heads, head_dim, tq, tk),
        out_shape=jax.ShapeDtypeStruct((B, T, E), x.dtype),
        grid=(B, n_t, n_t),
        in_specs=[
            pl.BlockSpec((1, tq, E), lambda b, qi, ki: (b, qi, 0)),           # x
            pl.BlockSpec((1, num_heads, tq, head_dim),
                         lambda b, qi, ki: (b, 0, qi, 0)),                    # q
            kv_spec(),                                                        # k
            kv_spec(),                                                        # v
            const(),                                                          # wo (H,Hd,E)
            const(),                                                          # bo
            const(), const(),                                                 # ln2 g/b
            const(), const(),                                                 # w1, b1
            const(), const(),                                                 # w2, b2
        ],
        out_specs=pl.BlockSpec((1, tq, E), lambda b, qi, ki: (b, qi, 0)),
        scratch_shapes=[
            pltpu.VMEM((num_heads, tq, 1), jnp.float32),           # m (running max)
            pltpu.VMEM((num_heads, tq, 1), jnp.float32),           # l (running sum)
            pltpu.VMEM((num_heads, tq, head_dim), jnp.float32),    # acc
        ],
        compiler_params=pltpu.CompilerParams(
            dimension_semantics=("parallel", "parallel", "arbitrary"),
            vmem_limit_bytes=vmem_limit,
        ),
    )(x, q, k, v, prep['wo'], prep['bo'], prep['ln2_g'], prep['ln2_b'],
      prep['w1'], prep['b1'], prep['w2'], prep['b2'])
    return out


# --------------------------------------------------------------------------------
# Pure-JAX f32 reference reproducing the PyTorch Block forward
# --------------------------------------------------------------------------------
def block_reference(x, params, num_heads):
    ln1_g, ln1_b, wq, wk, wv, wo, bo, ln2_g, ln2_b, w1, b1, w2, b2 = params

    def ln(z, g, b):
        mu = z.mean(-1, keepdims=True)
        var = ((z - mu) ** 2).mean(-1, keepdims=True)
        return (z - mu) / jnp.sqrt(var + 1e-5) * g + b

    B, T, E = x.shape
    H = num_heads
    Hd = E // H
    xn = ln(x, ln1_g[0], ln1_b[0])
    q = (xn @ wq).reshape(B, T, H, Hd).transpose(0, 2, 1, 3)
    k = (xn @ wk).reshape(B, T, H, Hd).transpose(0, 2, 1, 3)
    v = (xn @ wv).reshape(B, T, H, Hd).transpose(0, 2, 1, 3)
    s = jnp.einsum('bhtd,bhsd->bhts', q, k)          # no 1/sqrt(Hd) scale (as in ref)
    mask = jnp.tril(jnp.ones((T, T), bool))
    s = jnp.where(mask, s, -jnp.inf)
    p = jax.nn.softmax(s, axis=-1)
    att = jnp.einsum('bhts,bhsd->bhtd', p, v).transpose(0, 2, 1, 3).reshape(B, T, E)
    x1 = x + (att @ wo + bo[0])
    xn2 = ln(x1, ln2_g[0], ln2_b[0])
    ff = jax.nn.relu(xn2 @ w1 + b1[0]) @ w2 + b2[0]
    return x1 + ff


def init_params(key, embed_size, num_heads):
    """Deterministic synthetic parameters matching the PyTorch module's shapes."""
    E = embed_size
    H = num_heads
    Hd = E // H
    keys = jax.random.split(key, 8)
    scale = 0.02

    ln1_g = jnp.ones((1, E), jnp.float32)
    ln1_b = jnp.zeros((1, E), jnp.float32)
    # per-head K/Q/V Linear(E, Hd, bias=False), concatenated over heads -> (E, H*Hd)
    wq = scale * jax.random.normal(keys[0], (E, H * Hd), jnp.float32)
    wk = scale * jax.random.normal(keys[1], (E, H * Hd), jnp.float32)
    wv = scale * jax.random.normal(keys[2], (E, H * Hd), jnp.float32)
    # MHA output projection Linear(H*Hd, E)
    wo = scale * jax.random.normal(keys[3], (H * Hd, E), jnp.float32)
    bo = jnp.zeros((1, E), jnp.float32)
    ln2_g = jnp.ones((1, E), jnp.float32)
    ln2_b = jnp.zeros((1, E), jnp.float32)
    # feed-forward: Linear(E, E) -> ReLU -> Linear(E, E)
    w1 = scale * jax.random.normal(keys[4], (E, E), jnp.float32)
    b1 = scale * jax.random.normal(keys[5], (1, E), jnp.float32)
    w2 = scale * jax.random.normal(keys[6], (E, E), jnp.float32)
    b2 = scale * jax.random.normal(keys[7], (1, E), jnp.float32)

    return [ln1_g, ln1_b, wq, wk, wv, wo, bo, ln2_g, ln2_b, w1, b1, w2, b2]


if __name__ == "__main__":
    B, T, E = 2, 8, 32
    num_heads = 4

    key = jax.random.PRNGKey(0)
    k_x, k_p = jax.random.split(key)
    x = jax.random.normal(k_x, (B, T, E), jnp.float32)
    params = init_params(k_p, E, num_heads)
    prep = prepare_params(params, num_heads)   # one-time bf16 cast / layout prep

    out = jax.block_until_ready(block_forward(x, prep, num_heads))
    assert out.shape == (B, T, E)
    assert bool(jnp.all(jnp.isfinite(out)))

    ref = block_reference(x, params, num_heads)
    max_err = float(jnp.max(jnp.abs(out - ref)))
    assert max_err < 2e-2, f"max abs error vs reference: {max_err}"

    print("KERNEL_OK")
</pallas_src>

<mosaic_0001>
module attributes {stable_mosaic.version = 11 : i64} {
  func.func @qkv_proj_kernel(%arg0: i32, %arg1: i32, %arg2: memref<1x8x32xf32, #tpu.memory_space<vmem>>, %arg3: memref<1x32xf32, #tpu.memory_space<vmem>>, %arg4: memref<1x32xf32, #tpu.memory_space<vmem>>, %arg5: memref<32x32xbf16, #tpu.memory_space<vmem>>, %arg6: memref<32x32xbf16, #tpu.memory_space<vmem>>, %arg7: memref<32x32xbf16, #tpu.memory_space<vmem>>, %arg8: memref<1x4x8x8xbf16, #tpu.memory_space<vmem>>, %arg9: memref<1x4x8x8xbf16, #tpu.memory_space<vmem>>, %arg10: memref<1x4x8x8xbf16, #tpu.memory_space<vmem>>) attributes {dimension_semantics = [#tpu.dimension_semantics<parallel>, #tpu.dimension_semantics<parallel>], iteration_bounds = array<i64: 2, 1>, scalar_prefetch = 0 : i64, scratch_operands = 0 : i64, tpu.core_type = #tpu.core_type<tc>, window_params = [{transform_indices = @transform_0, window_bounds = array<i64: 1, 8, 32>}, {pipeline_mode = #tpu.pipeline_mode<synchronous>, transform_indices = @transform_1, window_bounds = array<i64: 1, 32>}, {pipeline_mode = #tpu.pipeline_mode<synchronous>, transform_indices = @transform_2, window_bounds = array<i64: 1, 32>}, {pipeline_mode = #tpu.pipeline_mode<synchronous>, transform_indices = @transform_3, window_bounds = array<i64: 32, 32>}, {pipeline_mode = #tpu.pipeline_mode<synchronous>, transform_indices = @transform_4, window_bounds = array<i64: 32, 32>}, {pipeline_mode = #tpu.pipeline_mode<synchronous>, transform_indices = @transform_5, window_bounds = array<i64: 32, 32>}, {transform_indices = @transform_6, window_bounds = array<i64: 1, 4, 8, 8>}, {transform_indices = @transform_7, window_bounds = array<i64: 1, 4, 8, 8>}, {transform_indices = @transform_8, window_bounds = array<i64: 1, 4, 8, 8>}]} {
    %c0 = arith.constant 0 : index
    %c0_0 = arith.constant 0 : index
    %c0_1 = arith.constant 0 : index
    %0 = vector.load %arg2[%c0, %c0_0, %c0_1] : memref<1x8x32xf32, #tpu.memory_space<vmem>>, vector<1x8x32xf32>
    %1 = vector.shape_cast %0 : vector<1x8x32xf32> to vector<8x32xf32>
    %c0_2 = arith.constant 0 : index
    %c0_3 = arith.constant 0 : index
    %2 = vector.load %arg3[%c0_2, %c0_3] : memref<1x32xf32, #tpu.memory_space<vmem>>, vector<1x32xf32>
    %3 = vector.shape_cast %2 : vector<1x32xf32> to vector<32xf32>
    %c0_4 = arith.constant 0 : index
    %c0_5 = arith.constant 0 : index
    %4 = vector.load %arg4[%c0_4, %c0_5] : memref<1x32xf32, #tpu.memory_space<vmem>>, vector<1x32xf32>
    %5 = vector.shape_cast %4 : vector<1x32xf32> to vector<32xf32>
    %cst = arith.constant dense<0.000000e+00> : vector<8xf32>
    %6 = vector.multi_reduction <add>, %1, %cst [1] : vector<8x32xf32> to vector<8xf32>
    %7 = vector.shape_cast %6 : vector<8xf32> to vector<8x1xf32>
    %cst_6 = arith.constant 3.200000e+01 : f32
    %8 = vector.broadcast %cst_6 : f32 to vector<8x1xf32>
    %9 = arith.divf %7, %8 : vector<8x1xf32>
    %10 = vector.broadcast %9 : vector<8x1xf32> to vector<8x32xf32>
    %11 = arith.subf %1, %10 : vector<8x32xf32>
    %12 = arith.mulf %11, %11 : vector<8x32xf32>
    %cst_7 = arith.constant dense<0.000000e+00> : vector<8xf32>
    %13 = vector.multi_reduction <add>, %12, %cst_7 [1] : vector<8x32xf32> to vector<8xf32>
    %14 = vector.shape_cast %13 : vector<8xf32> to vector<8x1xf32>
    %cst_8 = arith.constant 3.200000e+01 : f32
    %15 = vector.broadcast %cst_8 : f32 to vector<8x1xf32>
    %16 = arith.divf %14, %15 : vector<8x1xf32>
    %17 = vector.broadcast %9 : vector<8x1xf32> to vector<8x32xf32>
    %18 = arith.subf %1, %17 : vector<8x32xf32>
    %cst_9 = arith.constant 9.99999974E-6 : f32
    %19 = vector.broadcast %cst_9 : f32 to vector<8x1xf32>
    %20 = arith.addf %16, %19 : vector<8x1xf32>
    %21 = math.rsqrt %20 : vector<8x1xf32>
    %22 = vector.broadcast %21 : vector<8x1xf32> to vector<8x32xf32>
    %23 = arith.mulf %18, %22 : vector<8x32xf32>
    %24 = vector.shape_cast %3 : vector<32xf32> to vector<1x32xf32>
    %25 = vector.broadcast %24 : vector<1x32xf32> to vector<8x32xf32>
    %26 = arith.mulf %23, %25 : vector<8x32xf32>
    %27 = vector.shape_cast %5 : vector<32xf32> to vector<1x32xf32>
    %28 = vector.broadcast %27 : vector<1x32xf32> to vector<8x32xf32>
    %29 = arith.addf %26, %28 : vector<8x32xf32>
    %30 = arith.truncf %29 : vector<8x32xf32> to vector<8x32xbf16>
    %c0_10 = arith.constant 0 : index
    %c0_11 = arith.constant 0 : index
    %31 = vector.load %arg5[%c0_10, %c0_11] : memref<32x32xbf16, #tpu.memory_space<vmem>>, vector<32x32xbf16>
    %cst_12 = arith.constant dense<0.000000e+00> : vector<8x32xf32>
    %32 = tpu.matmul %30, %31, %cst_12 {dimension_numbers = #tpu.dot_dimension_numbers<[1], [0], [0], [1], [0, 0, 1, 1], [], []>} : vector<8x32xbf16>, vector<32x32xbf16>, vector<8x32xf32> -> vector<8x32xf32>
    %33 = arith.truncf %32 : vector<8x32xf32> to vector<8x32xbf16>
    %34 = vector.extract_strided_slice %33 {offsets = [0, 0], sizes = [8, 8], strides = [1, 1]} : vector<8x32xbf16> to vector<8x8xbf16>
    %c0_13 = arith.constant 0 : index
    %c0_14 = arith.constant 0 : index
    %c0_15 = arith.constant 0 : index
    %c0_16 = arith.constant 0 : index
    %35 = vector.load %arg8[%c0_13, %c0_14, %c0_15, %c0_16] : memref<1x4x8x8xbf16, #tpu.memory_space<vmem>>, vector<1x1x8x8xbf16>
    %36 = vector.shape_cast %35 : vector<1x1x8x8xbf16> to vector<8x8xbf16>
    %37 = vector.shape_cast %34 : vector<8x8xbf16> to vector<1x1x8x8xbf16>
    tpu.vector_store %arg8[%c0_13, %c0_14, %c0_15, %c0_16], %37 {strides = array<i32>} : memref<1x4x8x8xbf16, #tpu.memory_space<vmem>>, vector<1x1x8x8xbf16>,
    %38 = vector.extract_strided_slice %33 {offsets = [0, 8], sizes = [8, 8], strides = [1, 1]} : vector<8x32xbf16> to vector<8x8xbf16>
    %c0_17 = arith.constant 0 : index
    %c1 = arith.constant 1 : index
    %c0_18 = arith.constant 0 : index
    %c0_19 = arith.constant 0 : index
    %39 = vector.load %arg8[%c0_17, %c1, %c0_18, %c0_19] : memref<1x4x8x8xbf16, #tpu.memory_space<vmem>>, vector<1x1x8x8xbf16>
    %40 = vector.shape_cast %39 : vector<1x1x8x8xbf16> to vector<8x8xbf16>
    %41 = vector.shape_cast %38 : vector<8x8xbf16> to vector<1x1x8x8xbf16>
    tpu.vector_store %arg8[%c0_17, %c1, %c0_18, %c0_19], %41 {strides = array<i32>} : memref<1x4x8x8xbf16, #tpu.memory_space<vmem>>, vector<1x1x8x8xbf16>,
    %42 = vector.extract_strided_slice %33 {offsets = [0, 16], sizes = [8, 8], strides = [1, 1]} : vector<8x32xbf16> to vector<8x8xbf16>
    %c0_20 = arith.constant 0 : index
    %c2 = arith.constant 2 : index
    %c0_21 = arith.constant 0 : index
    %c0_22 = arith.constant 0 : index
    %43 = vector.load %arg8[%c0_20, %c2, %c0_21, %c0_22] : memref<1x4x8x8xbf16, #tpu.memory_space<vmem>>, vector<1x1x8x8xbf16>
    %44 = vector.shape_cast %43 : vector<1x1x8x8xbf16> to vector<8x8xbf16>
    %45 = vector.shape_cast %42 : vector<8x8xbf16> to vector<1x1x8x8xbf16>
    tpu.vector_store %arg8[%c0_20, %c2, %c0_21, %c0_22], %45 {strides = array<i32>} : memref<1x4x8x8xbf16, #tpu.memory_space<vmem>>, vector<1x1x8x8xbf16>,
    %46 = vector.extract_strided_slice %33 {offsets = [0, 24], sizes = [8, 8], strides = [1, 1]} : vector<8x32xbf16> to vector<8x8xbf16>
    %c0_23 = arith.constant 0 : index
    %c3 = arith.constant 3 : index
    %c0_24 = arith.constant 0 : index
    %c0_25 = arith.constant 0 : index
    %47 = vector.load %arg8[%c0_23, %c3, %c0_24, %c0_25] : memref<1x4x8x8xbf16, #tpu.memory_space<vmem>>, vector<1x1x8x8xbf16>
    %48 = vector.shape_cast %47 : vector<1x1x8x8xbf16> to vector<8x8xbf16>
    %49 = vector.shape_cast %46 : vector<8x8xbf16> to vector<1x1x8x8xbf16>
    tpu.vector_store %arg8[%c0_23, %c3, %c0_24, %c0_25], %49 {strides = array<i32>} : memref<1x4x8x8xbf16, #tpu.memory_space<vmem>>, vector<1x1x8x8xbf16>,
    %c0_26 = arith.constant 0 : index
    %c0_27 = arith.constant 0 : index
    %50 = vector.load %arg6[%c0_26, %c0_27] : memref<32x32xbf16, #tpu.memory_space<vmem>>, vector<32x32xbf16>
    %cst_28 = arith.constant dense<0.000000e+00> : vector<8x32xf32>
    %51 = tpu.matmul %30, %50, %cst_28 {dimension_numbers = #tpu.dot_dimension_numbers<[1], [0], [0], [1], [0, 0, 1, 1], [], []>} : vector<8x32xbf16>, vector<32x32xbf16>, vector<8x32xf32> -> vector<8x32xf32>
    %52 = arith.truncf %51 : vector<8x32xf32> to vector<8x32xbf16>
    %53 = vector.extract_strided_slice %52 {offsets = [0, 0], sizes = [8, 8], strides = [1, 1]} : vector<8x32xbf16> to vector<8x8xbf16>
    %c0_29 = arith.constant 0 : index
    %c0_30 = arith.constant 0 : index
    %c0_31 = arith.constant 0 : index
    %c0_32 = arith.constant 0 : index
    %54 = vector.load %arg9[%c0_29, %c0_30, %c0_31, %c0_32] : memref<1x4x8x8xbf16, #tpu.memory_space<vmem>>, vector<1x1x8x8xbf16>
    %55 = vector.shape_cast %54 : vector<1x1x8x8xbf16> to vector<8x8xbf16>
    %56 = vector.shape_cast %53 : vector<8x8xbf16> to vector<1x1x8x8xbf16>
    tpu.vector_store %arg9[%c0_29, %c0_30, %c0_31, %c0_32], %56 {strides = array<i32>} : memref<1x4x8x8xbf16, #tpu.memory_space<vmem>>, vector<1x1x8x8xbf16>,
    %57 = vector.extract_strided_slice %52 {offsets = [0, 8], sizes = [8, 8], strides = [1, 1]} : vector<8x32xbf16> to vector<8x8xbf16>
    %c0_33 = arith.constant 0 : index
    %c1_34 = arith.constant 1 : index
    %c0_35 = arith.constant 0 : index
    %c0_36 = arith.constant 0 : index
    %58 = vector.load %arg9[%c0_33, %c1_34, %c0_35, %c0_36] : memref<1x4x8x8xbf16, #tpu.memory_space<vmem>>, vector<1x1x8x8xbf16>
    %59 = vector.shape_cast %58 : vector<1x1x8x8xbf16> to vector<8x8xbf16>
    %60 = vector.shape_cast %57 : vector<8x8xbf16> to vector<1x1x8x8xbf16>
    tpu.vector_store %arg9[%c0_33, %c1_34, %c0_35, %c0_36], %60 {strides = array<i32>} : memref<1x4x8x8xbf16, #tpu.memory_space<vmem>>, vector<1x1x8x8xbf16>,
    %61 = vector.extract_strided_slice %52 {offsets = [0, 16], sizes = [8, 8], strides = [1, 1]} : vector<8x32xbf16> to vector<8x8xbf16>
    %c0_37 = arith.constant 0 : index
    %c2_38 = arith.constant 2 : index
    %c0_39 = arith.constant 0 : index
    %c0_40 = arith.constant 0 : index
    %62 = vector.load %arg9[%c0_37, %c2_38, %c0_39, %c0_40] : memref<1x4x8x8xbf16, #tpu.memory_space<vmem>>, vector<1x1x8x8xbf16>
    %63 = vector.shape_cast %62 : vector<1x1x8x8xbf16> to vector<8x8xbf16>
    %64 = vector.shape_cast %61 : vector<8x8xbf16> to vector<1x1x8x8xbf16>
    tpu.vector_store %arg9[%c0_37, %c2_38, %c0_39, %c0_40], %64 {strides = array<i32>} : memref<1x4x8x8xbf16, #tpu.memory_space<vmem>>, vector<1x1x8x8xbf16>,
    %65 = vector.extract_strided_slice %52 {offsets = [0, 24], sizes = [8, 8], strides = [1, 1]} : vector<8x32xbf16> to vector<8x8xbf16>
    %c0_41 = arith.constant 0 : index
    %c3_42 = arith.constant 3 : index
    %c0_43 = arith.constant 0 : index
    %c0_44 = arith.constant 0 : index
    %66 = vector.load %arg9[%c0_41, %c3_42, %c0_43, %c0_44] : memref<1x4x8x8xbf16, #tpu.memory_space<vmem>>, vector<1x1x8x8xbf16>
    %67 = vector.shape_cast %66 : vector<1x1x8x8xbf16> to vector<8x8xbf16>
    %68 = vector.shape_cast %65 : vector<8x8xbf16> to vector<1x1x8x8xbf16>
    tpu.vector_store %arg9[%c0_41, %c3_42, %c0_43, %c0_44], %68 {strides = array<i32>} : memref<1x4x8x8xbf16, #tpu.memory_space<vmem>>, vector<1x1x8x8xbf16>,
    %c0_45 = arith.constant 0 : index
    %c0_46 = arith.constant 0 : index
    %69 = vector.load %arg7[%c0_45, %c0_46] : memref<32x32xbf16, #tpu.memory_space<vmem>>, vector<32x32xbf16>
    %cst_47 = arith.constant dense<0.000000e+00> : vector<8x32xf32>
    %70 = tpu.matmul %30, %69, %cst_47 {dimension_numbers = #tpu.dot_dimension_numbers<[1], [0], [0], [1], [0, 0, 1, 1], [], []>} : vector<8x32xbf16>, vector<32x32xbf16>, vector<8x32xf32> -> vector<8x32xf32>
    %71 = arith.truncf %70 : vector<8x32xf32> to vector<8x32xbf16>
    %72 = vector.extract_strided_slice %71 {offsets = [0, 0], sizes = [8, 8], strides = [1, 1]} : vector<8x32xbf16> to vector<8x8xbf16>
    %c0_48 = arith.constant 0 : index
    %c0_49 = arith.constant 0 : index
    %c0_50 = arith.constant 0 : index
    %c0_51 = arith.constant 0 : index
    %73 = vector.load %arg10[%c0_48, %c0_49, %c0_50, %c0_51] : memref<1x4x8x8xbf16, #tpu.memory_space<vmem>>, vector<1x1x8x8xbf16>
    %74 = vector.shape_cast %73 : vector<1x1x8x8xbf16> to vector<8x8xbf16>
    %75 = vector.shape_cast %72 : vector<8x8xbf16> to vector<1x1x8x8xbf16>
    tpu.vector_store %arg10[%c0_48, %c0_49, %c0_50, %c0_51], %75 {strides = array<i32>} : memref<1x4x8x8xbf16, #tpu.memory_space<vmem>>, vector<1x1x8x8xbf16>,
    %76 = vector.extract_strided_slice %71 {offsets = [0, 8], sizes = [8, 8], strides = [1, 1]} : vector<8x32xbf16> to vector<8x8xbf16>
    %c0_52 = arith.constant 0 : index
    %c1_53 = arith.constant 1 : index
    %c0_54 = arith.constant 0 : index
    %c0_55 = arith.constant 0 : index
    %77 = vector.load %arg10[%c0_52, %c1_53, %c0_54, %c0_55] : memref<1x4x8x8xbf16, #tpu.memory_space<vmem>>, vector<1x1x8x8xbf16>
    %78 = vector.shape_cast %77 : vector<1x1x8x8xbf16> to vector<8x8xbf16>
    %79 = vector.shape_cast %76 : vector<8x8xbf16> to vector<1x1x8x8xbf16>
    tpu.vector_store %arg10[%c0_52, %c1_53, %c0_54, %c0_55], %79 {strides = array<i32>} : memref<1x4x8x8xbf16, #tpu.memory_space<vmem>>, vector<1x1x8x8xbf16>,
    %80 = vector.extract_strided_slice %71 {offsets = [0, 16], sizes = [8, 8], strides = [1, 1]} : vector<8x32xbf16> to vector<8x8xbf16>
    %c0_56 = arith.constant 0 : index
    %c2_57 = arith.constant 2 : index
    %c0_58 = arith.constant 0 : index
    %c0_59 = arith.constant 0 : index
    %81 = vector.load %arg10[%c0_56, %c2_57, %c0_58, %c0_59] : memref<1x4x8x8xbf16, #tpu.memory_space<vmem>>, vector<1x1x8x8xbf16>
    %82 = vector.shape_cast %81 : vector<1x1x8x8xbf16> to vector<8x8xbf16>
    %83 = vector.shape_cast %80 : vector<8x8xbf16> to vector<1x1x8x8xbf16>
    tpu.vector_store %arg10[%c0_56, %c2_57, %c0_58, %c0_59], %83 {strides = array<i32>} : memref<1x4x8x8xbf16, #tpu.memory_space<vmem>>, vector<1x1x8x8xbf16>,
    %84 = vector.extract_strided_slice %71 {offsets = [0, 24], sizes = [8, 8], strides = [1, 1]} : vector<8x32xbf16> to vector<8x8xbf16>
    %c0_60 = arith.constant 0 : index
    %c3_61 = arith.constant 3 : index
    %c0_62 = arith.constant 0 : index
    %c0_63 = arith.constant 0 : index
    %85 = vector.load %arg10[%c0_60, %c3_61, %c0_62, %c0_63] : memref<1x4x8x8xbf16, #tpu.memory_space<vmem>>, vector<1x1x8x8xbf16>
    %86 = vector.shape_cast %85 : vector<1x1x8x8xbf16> to vector<8x8xbf16>
    %87 = vector.shape_cast %84 : vector<8x8xbf16> to vector<1x1x8x8xbf16>
    tpu.vector_store %arg10[%c0_60, %c3_61, %c0_62, %c0_63], %87 {strides = array<i32>} : memref<1x4x8x8xbf16, #tpu.memory_space<vmem>>, vector<1x1x8x8xbf16>,
    return
  }
  func.func @transform_0(%arg0: i32, %arg1: i32) -> (i32, i32, i32) {
    %c0_i32 = arith.constant 0 : i32
    %c0_i32_0 = arith.constant 0 : i32
    return %arg0, %arg1, %c0_i32 : i32, i32, i32
  }
  func.func @transform_1(%arg0: i32, %arg1: i32) -> (i32, i32) {
    %c0_i32 = arith.constant 0 : i32
    %c0_i32_0 = arith.constant 0 : i32
    %c0_i32_1 = arith.constant 0 : i32
    return %c0_i32, %c0_i32_0 : i32, i32
  }
  func.func @transform_2(%arg0: i32, %arg1: i32) -> (i32, i32) {
    %c0_i32 = arith.constant 0 : i32
    %c0_i32_0 = arith.constant 0 : i32
    %c0_i32_1 = arith.constant 0 : i32
    return %c0_i32, %c0_i32_0 : i32, i32
  }
  func.func @transform_3(%arg0: i32, %arg1: i32) -> (i32, i32) {
    %c0_i32 = arith.constant 0 : i32
    %c0_i32_0 = arith.constant 0 : i32
    %c0_i32_1 = arith.constant 0 : i32
    return %c0_i32, %c0_i32_0 : i32, i32
  }
  func.func @transform_4(%arg0: i32, %arg1: i32) -> (i32, i32) {
    %c0_i32 = arith.constant 0 : i32
    %c0_i32_0 = arith.constant 0 : i32
    %c0_i32_1 = arith.constant 0 : i32
    return %c0_i32, %c0_i32_0 : i32, i32
  }
  func.func @transform_5(%arg0: i32, %arg1: i32) -> (i32, i32) {
    %c0_i32 = arith.constant 0 : i32
    %c0_i32_0 = arith.constant 0 : i32
    %c0_i32_1 = arith.constant 0 : i32
    return %c0_i32, %c0_i32_0 : i32, i32
  }
  func.func @transform_6(%arg0: i32, %arg1: i32) -> (i32, i32, i32, i32) {
    %c0_i32 = arith.constant 0 : i32
    %c0_i32_0 = arith.constant 0 : i32
    %c0_i32_1 = arith.constant 0 : i32
    return %arg0, %c0_i32, %arg1, %c0_i32_0 : i32, i32, i32, i32
  }
  func.func @transform_7(%arg0: i32, %arg1: i32) -> (i32, i32, i32, i32) {
    %c0_i32 = arith.constant 0 : i32
    %c0_i32_0 = arith.constant 0 : i32
    %c0_i32_1 = arith.constant 0 : i32
    return %arg0, %c0_i32, %arg1, %c0_i32_0 : i32, i32, i32, i32
  }
  func.func @transform_8(%arg0: i32, %arg1: i32) -> (i32, i32, i32, i32) {
    %c0_i32 = arith.constant 0 : i32
    %c0_i32_0 = arith.constant 0 : i32
    %c0_i32_1 = arith.constant 0 : i32
    return %arg0, %c0_i32, %arg1, %c0_i32_0 : i32, i32, i32, i32
  }
}

</mosaic_0001>

<bundles_post_ra>
// kernel: tpu_custom_call.1
= control target key start
LH: loop header
LB: loop body
LE: loop exit
PB: predicated region body
PF: predicated region fallthrough
CT: control target
= control target key end

     0   :  { %s1749_s0 = inlined_call_operand.hbm [shape: f32[2,8,32], index: 0, kind: input, shape index: {}]   ;;  %s1750_s1 = inlined_call_operand.vmem [shape: f32[1,32], index: 1, kind: input, shape index: {}]   ;;  %s1751_s2 = inlined_call_operand.vmem [shape: f32[1,32], index: 2, kind: input, shape index: {}]   ;;  %s1752_s3 = inlined_call_operand.hbm [shape: bf16[32,32], index: 3, kind: input, shape index: {}]   ;;  %s1753_s4 = inlined_call_operand.hbm [shape: bf16[32,32], index: 4, kind: input, shape index: {}]   ;;  %s1754_s5 = inlined_call_operand.hbm [shape: bf16[32,32], index: 5, kind: input, shape index: {}]   ;;  %s1755_s6 = inlined_call_operand.hbm [shape: bf16[2,4,8,8], index: 6, kind: output, shape index: {0}]   ;;  %s1756_s7 = inlined_call_operand.hbm [shape: bf16[2,4,8,8], index: 7, kind: output, shape index: {1}]   ;;  %s1757_s8 = inlined_call_operand.hbm [shape: bf16[2,4,8,8], index: 8, kind: output, shape index: {2}]  }
   0x1   :  { %1762 = sst [smem:[#allocation20_spill]] %s1752_s3 }
   0x2   :  { %1763 = sst [smem:[#allocation21_spill]] %s1753_s4 }
   0x3   :  { %1764 = sst [smem:[#allocation22_spill]] %s1754_s5 }
   0x4   :  { %14 = vsyncpa [#allocation3], 0 }
   0x5   :  { %16 = vsyncpa [#allocation3 + $0x1], 0 }
   0x6   :  { %17 = vsyncpa [#allocation6], 0 }
   0x7   :  { %18 = vsyncpa [#allocation9], 0 }
   0x8   :  { %19 = vsyncpa [#allocation4], 0 }
   0x9   :  { %21 = vsyncpa [#allocation4 + $0x1], 0 }
   0xa   :  { %22 = vsyncpa [#allocation12], 0 }
   0xb   :  { %24 = vsyncpa [#allocation12 + $0x1], 0  ;;  %s1430_s27 = smov 0   ;;  %s1432_s28 = smov 0  }
   0xc   :  { %s1434_s29 = smov 0   ;;  %s1436_s30 = smov 0  }
   0xd   :  { %s1438_s9 = smov 0   ;;  %s1440_s10 = smov 0  }
   0xe LB: > { %s1461_s11 = sadd.s32 4294967295, %s1367_s10   ;;  %s1760_s12 = sadd.s32 4294967294, %s1367_s10   ;;  %s1367_s10 = sphi %s1440_s10, %s30_s10   ;;  %s1363_s9 = sphi %s1438_s9, %s1789_s9   ;;  %s1359_s30 = sphi %s1436_s30, %s1788_s30   ;;  %s1355_s29 = sphi %s1434_s29, %s1787_s29   ;;  %s1351_s28 = sphi %s1432_s28, %s1786_s28   ;;  %s1347_s27 = sphi %s1430_s27, %s1785_s27  }
   0xf   : > { %p64_p0 = scmp.ne.s32.totalorder %s1351_s28, %s1347_s27  ;;  %p1758_p1 = scmp.eq.s32.totalorder %s1461_s11, 0 }
  0x10   : > { %p201_p3 = scmp.eq.s32.totalorder %s1760_s12, 1  ;;  %p909_p5 = scmp.ge.s32.totalorder %s1367_s10, 1 }
  0x11   : > { %p1472_p4 = por %p1758_p1, %p64_p0  ;;  %p264_p7 = scmp.lt.s32.totalorder %s1367_s10, 3 }
  0x12   : > { %p1477_p6 = por %p201_p3, %p64_p0  ;;  %s1369_s16 = smov [#allocation5]  }
  0x13   : > { %s1765_s13 = scalar_select %p1472_p4, 1, 0 }
  0x14   : > { %s1766_s14 = scalar_select %p1477_p6, 1, 0 }
  0x15   : > { %p1482_p8 = pnand %p909_p5, %p264_p7  ;;  %s282_s17 = sshll.u32 %s1369_s16, 4  ;;  %s283_s17 = int_to_ptr.vmem [resolvable:$true] %s282_s17 }
  0x16   : > { %s1370_s19 = smov [#allocation7]   ;;  %s1371_s21 = smov [#allocation8]  }
  0x17   : > { %p1017_p9 = pneg %p1482_p8  ;;  %s295_s20 = sshll.u32 %s1370_s19, 4  ;;  %s296_s20 = int_to_ptr.vmem [resolvable:$true] %s295_s20 }
  0x18   : > { %s308_s22 = sshll.u32 %s1371_s21, 4  ;;  %s1128_s23 = scalar_lea.vmem %s283_s17, 256  ;;  %s309_s22 = int_to_ptr.vmem [resolvable:$true] %s308_s22 }
  0x19   : > { %p1491_p11 = pnand %p1017_p9, %p1758_p1  ;;  %p1129_p13 = scmp.ne.s32.totalorder %s283_s17, %s1128_s23 }
  0x1a   : > { %p1136_p5 = scmp.lt.s32.totalorder %s283_s17, %s283_s17  ;;  %p1137_p7 = scmp.lt.s32.totalorder %s1128_s23, %s1128_s23 }
  0x1b   : > { %p1119_p12 = pneg %p1491_p11 }
  0x1c   : > { %p1138_p9 = por %p1137_p7, %p1136_p5 }
  0x1d   : > { %p1131_p0 = pnand %p1129_p13, %p1119_p12 }
  0x1f   : > { %p1132_p3 = pneg %p1131_p0 }
  0x21   : > { %p1139_p10 = pnand %p1138_p9, %p1132_p3 }
  0x23   : > { %1142 = shalt.err (!%p1139_p10)
}
  0x24   : > { %s1372_s24 = smov 64   ;;  %s1373_s25 = smov 4  }
  0x25   : > { %s1769_s3 = sld [smem:[#allocation20_spill]]  ;;  %s1154_s19 = scalar_lea.vmem %s296_s20, 256 }
  0x26   : > { %p1155_p1 = scmp.ne.s32.totalorder %s296_s20, %s1154_s19  ;;  %p1162_p2 = scmp.lt.s32.totalorder %s296_s20, %s296_s20 }
  0x27   : > { %p1163_p6 = scmp.lt.s32.totalorder %s1154_s19, %s1154_s19 }
  0x28   : > { %p1157_p13 = pnand %p1155_p1, %p1119_p12 }
  0x29   : > { %p1164_p5 = por %p1163_p6, %p1162_p2 }
  0x2a   : > { %p1158_p0 = pneg %p1157_p13 }
  0x2b   : > { %1020 = dma.hbm_to_vmem [thread:$0]  (!%p1491_p11), %s1769_s3, 256, %s283_s17, [#allocation6], %s1372_s24, %s1372_s24, %s1373_s25  }
  0x2c   : > { %p1165_p3 = pnand %p1164_p5, %p1158_p0 }
  0x2e   : > { %1168 = shalt.err (!%p1165_p3)
}
  0x2f   : > { %s1770_s4 = sld [smem:[#allocation21_spill]]  ;;  %s1180_s17 = scalar_lea.vmem %s309_s22, 256 }
  0x30   : > { %p1181_p10 = scmp.ne.s32.totalorder %s309_s22, %s1180_s17  ;;  %p1188_p9 = scmp.lt.s32.totalorder %s309_s22, %s309_s22 }
  0x31   : > { %p1189_p13 = scmp.lt.s32.totalorder %s1180_s17, %s1180_s17 }
  0x32   : > { %p1183_p7 = pnand %p1181_p10, %p1119_p12 }
  0x33   : > { %p1190_p4 = por %p1189_p13, %p1188_p9 }
  0x34   : > { %p1184_p1 = pneg %p1183_p7 }
  0x35   : > { %1023 = dma.hbm_to_vmem [thread:$0]  (!%p1491_p11), %s1770_s4, 256, %s296_s20, [#allocation6], %s1372_s24, %s1372_s24, %s1373_s25  }
  0x36   : > { %p1191_p2 = pnand %p1190_p4, %p1184_p1 }
  0x38   : > { %1194 = shalt.err (!%p1191_p2)
}
  0x39   : > { %s1771_s5 = sld [smem:[#allocation22_spill]]  ;;  %s51_s20 = sadd.s32 1, %s1355_s29 }
  0x3a   : > { %s42_s19 = sadd.s32 1, %s1363_s9  ;;  %p58_p4 = scmp.ne.s32.totalorder %s1355_s29, %s1351_s28 }
  0x3b   : > { %p44_p6 = scmp.ge.s32.totalorder %s42_s19, 2  ;;  %p59_p12 = scmp.eq.s32.totalorder %s1367_s10, 0 }
  0x3c   : > { %p1772_p0 = scmp.eq.s32.totalorder %s1461_s11, 1  ;;  %p1044_p3 = scmp.lt.s32.totalorder %s1367_s10, 2 }
  0x3d   : > { %s1791_s19 = smov (%p44_p6, %s42_s19), 0  ;;  %p60_p10 = por %p59_p12, %p58_p4 }
  0x3e   : > { %p1528_p5 = por %p1772_p0, %p58_p4  ;;  %1774 = sst [smem:[#allocation19_spill]] %s1791_s19 }
  0x3f   : > { %1026 = dma.hbm_to_vmem [thread:$0]  (!%p1491_p11), %s1771_s5, 256, %s309_s22, [#allocation9], %s1372_s24, %s1372_s24, %s1373_s25  }
  0x40   : > { %s322_s21 = sand.u32 1, %s1355_s29   ;;  %s46_s23 = ssub.s32 %s1363_s9, %s1791_s19 }
  0x41   : > { %p49_p7 = scmp.eq.s32.totalorder %s46_s23, 0  ;;  %s914_s22 = sshll.u32 %s322_s21, 3 }
  0x42   : > { %s915_s24 = sshll.u32 %s1363_s9, 7  ;;  %s326_s12 = scalar_lea.vmem [#allocation2], %s914_s22 }
  0x43   : > { %s1540_s25 = scalar_select %p49_p7, %s1355_s29, %s51_s20  }
  0x44   : > { %s332_s16 = scalar_lea.hbm %s1749_s0, %s915_s24  ;;  %s334_s3 = sshll.u32 %s326_s12, 4  ;;  %s335_s3 = int_to_ptr.vmem [resolvable:$true] %s334_s3 }
  0x45   : > { %p1547_p11 = pnand %p1044_p3, %p60_p10  ;;  %s323_s5 = scalar_lea.sflag [#allocation3], %s322_s21 }
  0x46   : > { %s1208_s23 = scalar_lea.vmem %s335_s3, 128  ;;  %s1374_s20 = smov [#allocation2]  }
  0x47   : > { %p1197_p1 = pneg %p1547_p11  ;;  %p1209_p9 = scmp.ne.s32.totalorder %s335_s3, %s1208_s23 }
  0x48   : > { %s1213_s19 = sshll.u32 %s1374_s20, 4  ;;  %s1214_s19 = int_to_ptr.vmem [resolvable:$false] %s1213_s19 }
  0x49   : > { %p1211_p13 = pnand %p1209_p9, %p1197_p1  ;;  %s1215_s24 = scalar_lea.vmem %s1214_s19, 256 }
  0x4a   : > { %p1216_p4 = scmp.lt.s32.totalorder %s335_s3, %s1214_s19  ;;  %p1217_p6 = scmp.lt.s32.totalorder %s1215_s24, %s1208_s23 }
  0x4b   : > { %p1212_p2 = pneg %p1211_p13 }
  0x4c   : > { %p1218_p12 = por %p1217_p6, %p1216_p4 }
  0x4e   : > { %p1219_p0 = pnand %p1218_p12, %p1212_p2 }
  0x50   : > { %1222 = shalt.err (!%p1219_p0)
}
  0x51   : > { %1030 = dma.hbm_to_vmem [thread:$0]  (!%p1547_p11), %s332_s16, 128, %s335_s3, %s323_s5  }
  0x52   : > { %343 = sbr.rel (%p1482_p8) target bundleno = 779 (0x30b), region = 44  ;;  %s1558_s12 = sand.u32 (!%p1482_p8), 1, %s1351_s28  }
  0x53   : > { %s917_s21 = sshll.u32 (!%p1482_p8), %s1558_s12, 3  ;;  %s346_s22 = scalar_lea.sflag (!%p1482_p8), [#allocation3], %s1558_s12 }
  0x54   : > { %s349_s17 = scalar_lea.vmem (!%p1482_p8), [#allocation2], %s917_s21  ;;  %p1776_p3 = scmp.ne.s32.totalorder (!%p1482_p8), %s1765_s13, 0 }
  0x57   : > { %1326 = dma.done.wait (%p1776_p3), %s346_s22, 128  }
  0x58   : > { %1328 = vsyncadd (%p1776_p3), %s346_s22, 4294967168  ;;  %p1777_p10 = scmp.eq.s32.totalorder %s1461_s11, 0 }
  0x5a   : > { %1330 = dma.done.wait (%p1777_p10), [#allocation6], 512   ;;  %p1778_p7 = pmov %p1777_p10 }
  0x5c   : > { %1332 = vsyncadd (%p1778_p7), [#allocation6], 4294966784  ;;  %p1779_p8 = pmov %p1778_p7 }
  0x5d   : > { %p1780_p11 = pmov %p1778_p7 }
  0x5e   : > { %1334 = dma.done.wait (%p1779_p8), [#allocation9], 256  }
  0x5f   : > { %1336 = vsyncadd (%p1780_p11), [#allocation9], 4294967040  ;;  %vm408_vm0 = vcmask 261120   ;;  %v405_v0 = vld [vmem:[%s349_s17] sm:$0xff]  ;;  %v1109_v7 = vld [vmem:[#allocation5 + $0x8] sm:$0xff]   ;;  %v1375_v9 = vmov 0.0  }
  0x60   : > { %v409_v1 = vsel %vm408_vm0, %v405_v0, 0.0  ;;  %v1110_v8 = vld [vmem:[#allocation7 + $0x8] sm:$0xff]   ;;  %973 = vmatprep.subr.bf16.mxu0 %v1375_v9  ;;  %981 = vmatprep.subr.bf16.mxu1 %v1375_v9  ;;  %v1111_v10 = vld [vmem:[#allocation5] sm:$0xff]   ;;  %v1112_v11 = vld [vmem:[#allocation7] sm:$0xff]   ;;  %vm1376_vm1 = vmmov 0   ;;  %s921_s15 = sshll.u32 %s1558_s12, 4 }
  0x61   : > { %410 = vadd.xlane.f32.xlu0 %v409_v1  ;;  %974 = vmatpush3.bf16.msra.mxu0 %v1109_v7  ;;  %v924_v16 = vld [vmem:[%s1750_s1] ss:$0 sm:$0xff]  ;;  %v1113_v21 = vld [vmem:[#allocation8 + $0x8] sm:$0xff]   ;;  %v1114_v23 = vld [vmem:[#allocation8] sm:$0xff]   ;;  %vm498_vm2 = vcmask 60416   ;;  %s1589_s19 = scalar_lea.vmem [#allocation10], %s921_s15 }
  0x62   : > { %982 = vmatpush3.bf16.msra.mxu1 %v1110_v8  ;;  %975 = vmatprep.subr.bf16.mxu0 %v1375_v9  ;;  %v925_v18 = vld [vmem:[%s1751_s2] ss:$0 sm:$0xff]  ;;  %s1593_s26 = scalar_lea.vmem [#allocation11], %s921_s15  ;;  %s1377_s16 = smov 104  }
  0x63   : > { %983 = vmatprep.subr.bf16.mxu1 %v1375_v9  ;;  %977 = vmatprep.mubr.msk.bf16.mxu0 %vm1376_vm1, %v1375_v9  ;;  %s1378_s23 = smov 120   ;;  %s1379_s20 = smov 112  }
  0x64   : > { %985 = vmatprep.mubr.msk.bf16.mxu1 %vm1376_vm1, %v1375_v9  ;;  %s1597_s24 = scalar_lea.vmem [#allocation13], %s921_s15  ;;  %s712_s21 = sshll.u32 %s1593_s26, 4  ;;  %s1606_s21 = int_to_ptr.vmem [resolvable:$true] %s712_s21 }
  0x65   : > { %976 = vmatpush3.bf16.msra.mxu0 %v1111_v10  ;;  %s675_s22 = sand.u32 1, %s1461_s11   ;;  %s1604_s17 = sshll.u32 %s1359_s30, 8 }
  0x66   : > { %984 = vmatpush3.bf16.msra.mxu1 %v1112_v11  ;;  %989 = vmatprep.subr.bf16.mxu0 %v1375_v9  ;;  %s1616_s5 = scalar_lea.hbm %s1756_s7, %s1604_s17  ;;  %s1620_s30 = scalar_lea.sflag [#allocation12], %s675_s22 }
  0x67   : > { %s1223_s11 = scalar_lea.vmem %s1606_s21, 256  ;;  %s1380_s13 = smov [#allocation11]  }
  0x68   : > { %p1224_p1 = scmp.ne.s32.totalorder %s1606_s21, %s1223_s11  ;;  %s1227_s15 = sshll.u32 %s1380_s13, 4  ;;  %s1228_s15 = int_to_ptr.vmem [resolvable:$false] %s1227_s15 }
  0x69   : > { %p1230_p2 = scmp.lt.s32.totalorder %s1606_s21, %s1228_s15 }
  0x6a   : > { %p1225_p9 = pnand %p1224_p1, %p1528_p5 }
  0x6c   : > { %p1226_p13 = pneg %p1225_p9 }
  0xea   : > { %v411_v2 = vpop.xlane.xlu0 %410 }
  0xeb   : > { %v413_v3 = vmul.f32 0.03125, %v411_v2 }
  0xed   : > { %v414_v4 = vsub.f32 %v405_v0, %v413_v3 }
  0xef   : > { %v415_v5 = vmul.f32 %v414_v4, %v414_v4 }
  0xf1   : > { %v416_v6 = vsel %vm408_vm0, %v415_v5, 0.0 }
  0xf2   : > { %417 = vadd.xlane.f32.xlu0 %v416_v6 }
 0x17b   : > { %v418_v12 = vpop.xlane.xlu0 %417 }
 0x17c   : > { %v419_v13 = vmul.f32 0.03125, %v418_v12 }
 0x17e   : > { %v420_v14 = vadd.f32 1e-05, %v419_v13 }
 0x180   : > { %1115 = vrsqrt.f32 %v420_v14 }
 0x18d   : > { %v1116_v15 = vpop.eup %1115 }
 0x18e   : > { %v422_v17 = vmul.f32 %v1116_v15, %v414_v4 }
 0x190   : > { %v429_v19 = vmul.f32 %v924_v16, %v422_v17 }
 0x192   : > { %v436_v20 = vadd.f32 %v925_v18, %v429_v19 }
 0x194   : > { %v437_v22 = vpack.c.bf16 %v436_v20, %v436_v20 }
 0x196   : > { %978 = vmatmul.mubr.msk.bf16.vlgmr.msra.gmra.mxu0 %vm408_vm0, %v437_v22  ;;  %986 = vmatmul.mubr.msk.bf16.vlgmr.msra.gmra.mxu1 %vm408_vm0, %v437_v22 }
 0x197   : > { %990 = vmatpush3.bf16.msra.mxu0 %v1113_v21  ;;  %993 = vmatprep.mubr.msk.bf16.mxu0 %vm1376_vm1, %v1375_v9 }
 0x198   : > { %991 = vmatprep.subr.bf16.mxu0 %v1375_v9 }
 0x19b   : > { %992 = vmatpush3.bf16.msra.mxu0 %v1114_v23 }
 0x19e   : > { %994 = vmatmul.mubr.msk.bf16.vlgmr.msra.gmra.mxu0 %vm408_vm0, %v437_v22 }
 0x256   : > { %v491_v24 = vpop.f32.mrf.mxu0  ;;  %v568_v25 = vpop.f32.mrf.mxu1 }
 0x257   : > { %v497_v26 = vpack.c.bf16 %v491_v24, %v491_v24  ;;  %v574_v27 = vpack.c.bf16 %v568_v25, %v568_v25 }
 0x258   : > { %v979_v28 = vpop.f32.mrf.mxu0  ;;  %v987_v29 = vpop.f32.mrf.mxu1 }
 0x259   : > { %499 = vst.msk [vmem:[%s1589_s19] sm:$0xf] %vm498_vm2, %v497_v26  ;;  %575 = vst.msk [vmem:[%s1593_s26] sm:$0xf] %vm498_vm2, %v574_v27  ;;  %589 = vrot.lane.b32.xlu0 %v574_v27, %s1377_s16  ;;  %579 = vrot.lane.b32.xlu1 %v574_v27, %s1378_s23 }
 0x25a   : > { %v494_v30 = vpop.f32.mrf.mxu0  ;;  %v571_v31 = vpop.f32.mrf.mxu1 }
 0x25c   : > { %v980_v32 = vpop.f32.mrf.mxu0  ;;  %v988_v33 = vpop.f32.mrf.mxu1 }
 0x25d   : > { %584 = vrot.lane.b32.xlu1 %v574_v27, %s1379_s20 }
 0x25e   : > { %v644_v34 = vpop.f32.mrf.mxu0 }
 0x25f   : > { %v650_v35 = vpack.c.bf16 %v644_v34, %v644_v34 }
 0x260   : > { %v995_v36 = vpop.f32.mrf.mxu0 }
 0x261   : > { %651 = vst.msk [vmem:[%s1597_s24] sm:$0xf] %vm498_vm2, %v650_v35  ;;  %503 = vrot.lane.b32.xlu1 %v497_v26, %s1378_s23 }
 0x262   : > { %v647_v37 = vpop.f32.mrf.mxu0 }
 0x264   : > { %v996_v38 = vpop.f32.mrf.mxu0 }
 0x265   : > { %508 = vrot.lane.b32.xlu1 %v497_v26, %s1379_s20 }
 0x269   : > { %513 = vrot.lane.b32.xlu1 %v497_v26, %s1377_s16 }
 0x26d   : > { %655 = vrot.lane.b32.xlu1 %v650_v35, %s1378_s23 }
 0x271   : > { %660 = vrot.lane.b32.xlu1 %v650_v35, %s1379_s20 }
 0x275   : > { %665 = vrot.lane.b32.xlu1 %v650_v35, %s1377_s16  ;;  %s1229_s16 = scalar_lea.vmem %s1228_s15, 512 }
 0x276   : > { %p1231_p4 = scmp.lt.s32.totalorder %s1229_s16, %s1223_s11 }
 0x278   : > { %p1232_p6 = por %p1231_p4, %p1230_p2 }
 0x27a   : > { %p1233_p12 = pnand %p1232_p6, %p1226_p13 }
 0x2cb   : > { %v590_v39 = vpop.permute.xlu0 %589  ;;  %v580_v40 = vpop.permute.xlu1 %579 }
 0x2cc   : > { %939 = vst.msk [vmem:[%s1593_s26 + $0xc] sm:$0xf] %vm498_vm2, %v590_v39  ;;  %937 = vst.msk [vmem:[%s1593_s26 + $0x4] sm:$0xf] %vm498_vm2, %v580_v40 }
 0x2cf   : > { %v585_v41 = vpop.permute.xlu1 %584 }
 0x2d0   : > { %938 = vst.msk [vmem:[%s1593_s26 + $0x8] sm:$0xf] %vm498_vm2, %v585_v41 }
 0x2d1   : > { %1236 = shalt.err (!%p1233_p12)
}
 0x2d2   : > { %s1237_s26 = scalar_lea.hbm %s1616_s5, 256  ;;  %s1241_s22 = scalar_lea.hbm %s1756_s7, 512 }
 0x2d3   : > { %p1238_p0 = scmp.ne.s32.totalorder %s1616_s5, %s1237_s26  ;;  %p1242_p7 = scmp.lt.s32.totalorder %s1616_s5, %s1756_s7 }
 0x2d4   : > { %p1243_p8 = scmp.lt.s32.totalorder %s1241_s22, %s1237_s26 }
 0x2d5   : > { %p1239_p3 = pnand %p1238_p0, %p1528_p5 }
 0x2d6   : > { %p1244_p11 = por %p1243_p8, %p1242_p7 }
 0x2d7   : > { %p1240_p10 = pneg %p1239_p3 }
 0x2d9   : > { %p1245_p1 = pnand %p1244_p11, %p1240_p10 }
 0x2db   : > { %1248 = shalt.err (!%p1245_p1)
}
 0x2dc   : > { %s1381_s11 = smov 64   ;;  %s1382_s13 = smov 4   ;;  %v504_v42 = vpop.permute.xlu1 %503 }
 0x2dd   : > { %1012 = dma.vmem_to_hbm [thread:$0]  (%p1528_p5), %s1606_s21, 256, %s1616_s5, %s1620_s30, %s1381_s11, %s1381_s11, %s1382_s13  }
 0x2de   : > { %930 = vst.msk [vmem:[%s1589_s19 + $0x4] sm:$0xf] %vm498_vm2, %v504_v42  ;;  %s695_s15 = sshll.u32 %s1589_s19, 4  ;;  %s1657_s23 = scalar_lea.hbm %s1755_s6, %s1604_s17  ;;  %s1651_s15 = int_to_ptr.vmem [resolvable:$true] %s695_s15 }
 0x2df   : > { %s671_s21 = scalar_lea.sflag [#allocation4], %s1558_s12  ;;  %s1249_s5 = scalar_lea.vmem %s1651_s15, 256 }
 0x2e0   : > { %v509_v43 = vpop.permute.xlu1 %508  ;;  %p1250_p9 = scmp.ne.s32.totalorder %s1651_s15, %s1249_s5  ;;  %s1383_s20 = smov [#allocation10]  }
 0x2e1   : > { %931 = vst.msk [vmem:[%s1589_s19 + $0x8] sm:$0xf] %vm498_vm2, %v509_v43  ;;  %s1253_s22 = sshll.u32 %s1383_s20, 4  ;;  %s1254_s22 = int_to_ptr.vmem [resolvable:$false] %s1253_s22 }
 0x2e2   : > { %p1251_p13 = pnand %p1250_p9, %p1528_p5  ;;  %s1255_s3 = scalar_lea.vmem %s1254_s22, 512 }
 0x2e3   : > { %p1256_p4 = scmp.lt.s32.totalorder %s1651_s15, %s1254_s22  ;;  %p1257_p6 = scmp.lt.s32.totalorder %s1255_s3, %s1249_s5 }
 0x2e4   : > { %v514_v44 = vpop.permute.xlu1 %513  ;;  %p1252_p2 = pneg %p1251_p13 }
 0x2e5   : > { %932 = vst.msk [vmem:[%s1589_s19 + $0xc] sm:$0xf] %vm498_vm2, %v514_v44  ;;  %p1258_p12 = por %p1257_p6, %p1256_p4 }
 0x2e7   : > { %p1259_p0 = pnand %p1258_p12, %p1252_p2 }
 0x2e9   : > { %1262 = shalt.err (!%p1259_p0)
}
 0x2ea   : > { %s1263_s19 = scalar_lea.hbm %s1657_s23, 256  ;;  %s1267_s16 = scalar_lea.hbm %s1755_s6, 512 }
 0x2eb   : > { %p1264_p3 = scmp.ne.s32.totalorder %s1657_s23, %s1263_s19  ;;  %p1268_p8 = scmp.lt.s32.totalorder %s1657_s23, %s1755_s6 }
 0x2ec   : > { %p1269_p11 = scmp.lt.s32.totalorder %s1267_s16, %s1263_s19 }
 0x2ed   : > { %p1265_p10 = pnand %p1264_p3, %p1528_p5 }
 0x2ee   : > { %p1270_p1 = por %p1269_p11, %p1268_p8 }
 0x2ef   : > { %p1266_p7 = pneg %p1265_p10 }
 0x2f1   : > { %p1271_p9 = pnand %p1270_p1, %p1266_p7 }
 0x2f3   : > { %1274 = shalt.err (!%p1271_p9)
}
 0x2f4   : > { %1011 = dma.vmem_to_hbm [thread:$0]  (%p1528_p5), %s1651_s15, 256, %s1657_s23, %s671_s21, %s1381_s11, %s1381_s11, %s1382_s13   ;;  %v656_v45 = vpop.permute.xlu1 %655 }
 0x2f5   : > { %944 = vst.msk [vmem:[%s1597_s24 + $0x4] sm:$0xf] %vm498_vm2, %v656_v45  ;;  %s729_s5 = sshll.u32 %s1597_s24, 4  ;;  %s1696_s19 = scalar_lea.hbm %s1757_s8, %s1604_s17  ;;  %s1690_s5 = int_to_ptr.vmem [resolvable:$true] %s729_s5 }
 0x2f6   : > { %s1275_s15 = scalar_lea.vmem %s1690_s5, 256  ;;  %s1384_s23 = smov [#allocation13]  }
 0x2f7   : > { %p1276_p13 = scmp.ne.s32.totalorder %s1690_s5, %s1275_s15  ;;  %s1279_s21 = sshll.u32 %s1384_s23, 4  ;;  %s1280_s21 = int_to_ptr.vmem [resolvable:$false] %s1279_s21 }
 0x2f8   : > { %v661_v46 = vpop.permute.xlu1 %660  ;;  %s1281_s12 = scalar_lea.vmem %s1280_s21, 512  ;;  %p1282_p6 = scmp.lt.s32.totalorder %s1690_s5, %s1280_s21 }
 0x2f9   : > { %945 = vst.msk [vmem:[%s1597_s24 + $0x8] sm:$0xf] %vm498_vm2, %v661_v46  ;;  %p1277_p2 = pnand %p1276_p13, %p1528_p5  ;;  %p1283_p12 = scmp.lt.s32.totalorder %s1281_s12, %s1275_s15 }
 0x2fb   : > { %p1278_p4 = pneg %p1277_p2  ;;  %p1284_p0 = por %p1283_p12, %p1282_p6 }
 0x2fc   : > { %v666_v47 = vpop.permute.xlu1 %665 }
 0x2fd   : > { %946 = vst.msk [vmem:[%s1597_s24 + $0xc] sm:$0xf] %vm498_vm2, %v666_v47  ;;  %p1285_p3 = pnand %p1284_p0, %p1278_p4 }
 0x2ff   : > { %1288 = shalt.err (!%p1285_p3)
}
 0x300   : > { %s1289_s17 = scalar_lea.hbm %s1696_s19, 256  ;;  %s1293_s16 = scalar_lea.hbm %s1757_s8, 512 }
 0x301   : > { %p1290_p10 = scmp.ne.s32.totalorder %s1696_s19, %s1289_s17  ;;  %p1294_p11 = scmp.lt.s32.totalorder %s1696_s19, %s1757_s8 }
 0x302   : > { %p1295_p1 = scmp.lt.s32.totalorder %s1293_s16, %s1289_s17 }
 0x303   : > { %p1291_p7 = pnand %p1290_p10, %p1528_p5 }
 0x304   : > { %p1296_p9 = por %p1295_p1, %p1294_p11 }
 0x305   : > { %p1292_p8 = pneg %p1291_p7 }
 0x307   : > { %p1297_p13 = pnand %p1296_p9, %p1292_p8 }
 0x309   : > { %1300 = shalt.err (!%p1297_p13)
}
 0x30a   : > { %1013 = dma.vmem_to_hbm [thread:$0]  (%p1528_p5), %s1690_s5, 256, %s1696_s19, %s1620_s30, %s1381_s11, %s1381_s11, %s1382_s13  }
 0x30b PF: > { %s744_s22 = sand.u32 1, %s1347_s27   ;;  %p1781_p2 = scmp.ne.s32.totalorder %s1766_s14, 0 }
 0x30c   : > { %p1782_p4 = scmp.ge.s32.totalorder %s1367_s10, 2  ;;  %s745_s3 = scalar_lea.sflag [#allocation4], %s744_s22 }
 0x30e   : > { %p1032_p6 = pnand %p1782_p4, %p1781_p2 }
 0x310   : > { %p1033_p12 = pneg %p1032_p6 }
 0x312   : > { %1338 = dma.done.wait (%p1033_p12), %s745_s3, 256  }
 0x313   : > { %1340 = vsyncadd (%p1033_p12), %s745_s3, 4294967040  ;;  %s1783_s18 = sadd.s32 4294967294, %s1367_s10  }
 0x314   : > { %s753_s15 = sand.u32 1, %s1783_s18  }
 0x315   : > { %s754_s23 = scalar_lea.sflag [#allocation12], %s753_s15 }
 0x316   : > { %1342 = dma.done.wait (%p1033_p12), %s754_s23, 512  }
 0x317   : > { %1344 = vsyncadd (%p1033_p12), %s754_s23, 4294966784  ;;  %s30_s10 = sadd.s32 1, %s1367_s10   ;;  %s1784_s14 = sld [smem:[#allocation19_spill]] }
 0x318   : > { %p27_p5 = scmp.ge.s32.totalorder %s30_s10, 4   ;;  %s1785_s27 = smov %s1351_s28 }
 0x319   : > { %s1786_s28 = smov %s1355_s29  ;;  %s1787_s29 = smov %s1540_s25 }
 0x31a   : > { %s1788_s30 = smov %s1363_s9  ;;  %29 = sbr.rel (!%p27_p5) target bundleno = 14 (0xe), region = 142 }
 0x31d   : > { %s1789_s9 = smov %s1784_s14 }
 0x31f   :  { %768 = vsyncpa [#allocation3], 1 }
 0x320   :  { %770 = vsyncpa [#allocation3 + $0x1], 1 }
 0x321   :  { %771 = vsyncpa [#allocation6], 1 }
 0x322   :  { %772 = vsyncpa [#allocation9], 1 }
 0x323   :  { %773 = vsyncpa [#allocation4], 1 }
 0x324   :  { %775 = vsyncpa [#allocation4 + $0x1], 1 }
 0x325   :  { %776 = vsyncpa [#allocation12], 1 }
 0x326   :  { %778 = vsyncpa [#allocation12 + $0x1], 1 }

</bundles_post_ra>
